<compile_context>
chip_gen: v6e
topology: v6e:2x2x1
jax: 0.10.0
libtpu: 0.0.40
codegen_flags: <defaults>
</compile_context>

<pallas_src>
import functools

import jax
import jax.numpy as jnp
from jax.experimental import pallas as pl
from jax.experimental.pallas import tpu as pltpu


def _round_up(x, m):
    return (x + m - 1) // m * m


# --------------------------------------------------------------------------
# Kernel A: pre-pass  tanh(z), bf16 pre-scaled zt, f32 row norms (+inf on pad)
# --------------------------------------------------------------------------
def _prepass_kernel(z_ref, zt_ref, zts_ref, zz_ref, *, scale, n_valid, n_total):
    zt = jnp.tanh(z_ref[...].astype(jnp.float32))                 # (bn, D)
    zt_ref[...] = zt.astype(zt_ref.dtype)
    zts_ref[...] = (zt * (2.0 * scale)).astype(jnp.bfloat16)      # MXU feed
    zz = scale * jnp.sum(zt * zt, axis=1, keepdims=True)          # (bn, 1)
    if n_valid != n_total:       # static: only emitted when N was padded
        row = (pl.program_id(0) * zt.shape[0]
               + jax.lax.broadcasted_iota(jnp.int32, zz.shape, 0))
        zz = jnp.where(row < n_valid, zz, jnp.inf)                # pad -> +inf
    zz_ref[...] = zz


# --------------------------------------------------------------------------
# Kernel B (fast path): exact logsumexp over N, zt resident in VMEM
# --------------------------------------------------------------------------
def _lse_single_kernel(zts_ref, zz_ref, e_ref, lse_ref):
    # cross[n, m] = 2*scale * sum_d tanh(z)[n, d] * e[m, d]
    # contraction over D of both operands (no transposed copy of e).
    cross = jax.lax.dot_general(
        zts_ref[...], e_ref[...],
        dimension_numbers=(((1,), (1,)), ((), ())),
        preferred_element_type=jnp.float32)                       # (n_pad, bm)
    scaled = cross - zz_ref[...]       # padded N rows: -inf (zz = +inf)
    m = jnp.max(scaled, axis=0, keepdims=True)                    # (1, bm)
    l = jnp.sum(jnp.exp(scaled - m), axis=0, keepdims=True)
    lse_ref[...] = m + jnp.log(l)


# --------------------------------------------------------------------------
# Kernel B (streaming path): online logsumexp over the N grid axis
# --------------------------------------------------------------------------
def _lse_stream_kernel(zts_ref, zz_ref, e_ref, lse_ref, m_sc, l_sc):
    ni = pl.program_id(1)

    @pl.when(ni == 0)
    def _init():
        m_sc[...] = jnp.full(m_sc.shape, -jnp.inf, dtype=m_sc.dtype)
        l_sc[...] = jnp.zeros(l_sc.shape, dtype=l_sc.dtype)

    cross = jax.lax.dot_general(
        zts_ref[...], e_ref[...],
        dimension_numbers=(((1,), (1,)), ((), ())),
        preferred_element_type=jnp.float32)                       # (bn, bm)
    scaled = cross - zz_ref[...]       # padded N rows already -inf via zz=+inf

    m_prev = m_sc[...]
    m_new = jnp.maximum(m_prev, jnp.max(scaled, axis=0, keepdims=True))
    l_sc[...] = (jnp.exp(m_prev - m_new) * l_sc[...]
                 + jnp.sum(jnp.exp(scaled - m_new), axis=0, keepdims=True))
    m_sc[...] = m_new

    @pl.when(ni == pl.num_programs(1) - 1)
    def _finalize():
        lse_ref[...] = m_sc[...] + jnp.log(l_sc[...])


# --------------------------------------------------------------------------
# Wrapper
# --------------------------------------------------------------------------
@functools.partial(jax.jit, static_argnames=("sigma",))
def _latent_layer_pallas(z, e, sigma):
    N, D = z.shape
    M = e.shape[0]
    scale = 1.0 / (2.0 * float(sigma) ** 2)          # compile-time constant

    # ---- M tiling: lane-dense, large blocks, >=2 tiles for v7x when free ----
    m_pad = _round_up(M, 128)
    block_m = 128
    for cand in (2048, 1024, 512, 256):
        if m_pad % cand == 0:
            block_m = cand
            break
    if m_pad // block_m == 1 and block_m >= 512:
        block_m //= 2        # keep the "parallel" M axis splittable across 2 TCs

    # ---- N tiling: fast (resident zt, exact LSE) vs streaming (online LSE) ----
    n_pad8 = _round_up(N, 8)
    use_fast = n_pad8 <= 2048
    if use_fast:
        block_n = n_pad8
        n_pad = n_pad8
        # Cap block_m so ~3 live (n_pad, block_m) f32 temps stay under ~24 MiB
        # (comfortable under v7x's 64 MiB VMEM with double-buffered inputs).
        while block_m > 128 and n_pad * block_m > 2 * 1024 * 1024:
            block_m //= 2
    else:
        block_n = 512
        n_pad = _round_up(n_pad8, block_n)

    z_p = z if n_pad == N else jnp.pad(z, ((0, n_pad - N), (0, 0)))
    e_p = e if m_pad == M else jnp.pad(e, ((0, m_pad - M), (0, 0)))
    e_bf = e_p.astype(jnp.bfloat16)                  # cast once, not per step

    # ---- Kernel A: pre-pass ----------------------------------------------
    kernel_a = functools.partial(
        _prepass_kernel, scale=scale, n_valid=N, n_total=n_pad)
    zt_p, zts_p, zz_p = pl.pallas_call(
        kernel_a,
        out_shape=(jax.ShapeDtypeStruct((n_pad, D), jnp.float32),
                   jax.ShapeDtypeStruct((n_pad, D), jnp.bfloat16),
                   jax.ShapeDtypeStruct((n_pad, 1), jnp.float32)),
        grid=(n_pad // block_n,),
        in_specs=[pl.BlockSpec((block_n, D), lambda i: (i, 0))],
        out_specs=(pl.BlockSpec((block_n, D), lambda i: (i, 0)),
                   pl.BlockSpec((block_n, D), lambda i: (i, 0)),
                   pl.BlockSpec((block_n, 1), lambda i: (i, 0))),
        compiler_params=pltpu.CompilerParams(
            dimension_semantics=("parallel",)),
    )(z_p)

    # ---- Kernel B: logsumexp over N ----------------------------------------
    if use_fast:
        lse_partial = pl.pallas_call(
            _lse_single_kernel,
            out_shape=jax.ShapeDtypeStruct((1, m_pad), jnp.float32),
            grid_spec=pltpu.PrefetchScalarGridSpec(
                num_scalar_prefetch=0,
                grid=(m_pad // block_m,),
                in_specs=[
                    pl.BlockSpec((n_pad, D), lambda mi: (0, 0)),   # zt_s resident
                    pl.BlockSpec((n_pad, 1), lambda mi: (0, 0)),   # zz resident
                    pl.BlockSpec((block_m, D), lambda mi: (mi, 0)),
                ],
                out_specs=pl.BlockSpec((1, block_m), lambda mi: (0, mi)),
            ),
            compiler_params=pltpu.CompilerParams(
                dimension_semantics=("parallel",),
                vmem_limit_bytes=48 * 1024 * 1024),
        )(zts_p, zz_p, e_bf)
    else:
        lse_partial = pl.pallas_call(
            _lse_stream_kernel,
            out_shape=jax.ShapeDtypeStruct((1, m_pad), jnp.float32),
            grid_spec=pltpu.PrefetchScalarGridSpec(
                num_scalar_prefetch=0,
                grid=(m_pad // block_m, n_pad // block_n),  # (M tiles, N tiles)
                in_specs=[
                    pl.BlockSpec((block_n, D), lambda mi, ni: (ni, 0)),  # zt_s
                    pl.BlockSpec((block_n, 1), lambda mi, ni: (ni, 0)),  # zz
                    pl.BlockSpec((block_m, D), lambda mi, ni: (mi, 0)),  # e
                ],
                out_specs=pl.BlockSpec((1, block_m), lambda mi, ni: (0, mi)),
                scratch_shapes=[pltpu.VMEM((1, block_m), jnp.float32),  # run max
                                pltpu.VMEM((1, block_m), jnp.float32)],  # run sum
            ),
            compiler_params=pltpu.CompilerParams(
                dimension_semantics=("parallel", "arbitrary"),
                vmem_limit_bytes=48 * 1024 * 1024),
        )(zts_p, zz_p, e_bf)

    # Epilogue: add back -scale*||e_m||^2 (constant over n), drop padded M
    # columns, finish the mean.
    lse = lse_partial[0, :M] - scale * jnp.sum(e * e, axis=1)
    loss = -jnp.mean(lse)

    z_out = zt_p if n_pad == N else zt_p[:N]
    return z_out, loss


def latent_layer_forward(data, *, M, sigma, key):
    """JAX/Pallas equivalent of LatentLayer.forward."""
    z = data["z"]
    z_dim = z.shape[1]
    # e = rand(M, z_dim) * 2 - 1  (uniform in [-1, 1)); drawn with jax.random.
    # TODO(synk): torch's RNG stream cannot be matched bit-for-bit; e could also
    # be generated in-kernel with pltpu.prng_seed/stateful_uniform to skip the
    # HBM round trip, which would change the stream again.
    e = jax.random.uniform(key, (M, z_dim), dtype=jnp.float32,
                           minval=-1.0, maxval=1.0)
    z_out, loss = _latent_layer_pallas(z, e, float(sigma))
    out = dict(data)
    out["z"] = z_out
    out["lse_loss"] = loss
    return out


# --------------------------------------------------------------------------
# Pure-JAX reference (mirrors the torch code) for validation
# --------------------------------------------------------------------------
def _reference_forward(z, e, sigma):
    zt = jnp.tanh(z)
    diff = zt[:, None, :] - e[None, :, :]                     # (N, M, D)
    dist = jnp.sum(diff * diff, axis=2)                       # (N, M)
    scaled = -1.0 / (2.0 * sigma ** 2) * dist
    lse = jax.nn.logsumexp(scaled, axis=0)                    # (M,)
    return zt, -jnp.mean(lse)


if __name__ == "__main__":
    def run_case(N, z_dim, M, sigma, key):
        k_z, k_e = jax.random.split(key)
        z = jax.random.normal(k_z, (N, z_dim), dtype=jnp.float32)
        data = {"z": z}

        out = latent_layer_forward(data, M=M, sigma=sigma, key=k_e)
        jax.block_until_ready(out["z"])
        jax.block_until_ready(out["lse_loss"])

        # Validate against the pure-JAX reference (same e draw).
        e = jax.random.uniform(k_e, (M, z_dim), dtype=jnp.float32,
                               minval=-1.0, maxval=1.0)
        zt_ref, loss_ref = _reference_forward(z, e, sigma)
        assert out["z"].shape == (N, z_dim)
        assert jnp.allclose(out["z"], zt_ref, atol=1e-5, rtol=1e-5)
        # Loose-ish tolerance on the scalar loss: the cross-term matmul runs in
        # bf16 (f32 accumulate), the reference is full f32.
        assert jnp.allclose(out["lse_loss"], loss_ref, atol=5e-2, rtol=2e-2), (
            float(out["lse_loss"]), float(loss_ref))

    key = jax.random.PRNGKey(0)
    k1, k2, k3 = jax.random.split(key, 3)
    run_case(8, 32, 16, 0.5, k1)      # fast path, aligned N, padded M lanes
    run_case(13, 32, 40, 0.7, k2)     # fast path, padded N rows + padded M
    run_case(2100, 32, 300, 0.8, k3)  # streaming path (online LSE over N tiles)

    print("KERNEL_OK")
</pallas_src>

<mosaic_0001>
module attributes {stable_mosaic.version = 11 : i64} {
  func.func @_lse_single_kernel(%arg0: i32, %arg1: memref<8x32xbf16, #tpu.memory_space<vmem>>, %arg2: memref<8x1xf32, #tpu.memory_space<vmem>>, %arg3: memref<128x32xbf16, #tpu.memory_space<vmem>>, %arg4: memref<1x128xf32, #tpu.memory_space<vmem>>) attributes {dimension_semantics = [#tpu.dimension_semantics<parallel>], iteration_bounds = array<i64: 1>, scalar_prefetch = 0 : i64, scratch_operands = 0 : i64, tpu.core_type = #tpu.core_type<tc>, window_params = [{pipeline_mode = #tpu.pipeline_mode<synchronous>, transform_indices = @transform_0, window_bounds = array<i64: 8, 32>}, {pipeline_mode = #tpu.pipeline_mode<synchronous>, transform_indices = @transform_1, window_bounds = array<i64: 8, 1>}, {transform_indices = @transform_2, window_bounds = array<i64: 128, 32>}, {transform_indices = @transform_3, window_bounds = array<i64: 1, 128>}]} {
    %c0 = arith.constant 0 : index
    %c0_0 = arith.constant 0 : index
    %0 = vector.load %arg1[%c0, %c0_0] : memref<8x32xbf16, #tpu.memory_space<vmem>>, vector<8x32xbf16>
    %c0_1 = arith.constant 0 : index
    %c0_2 = arith.constant 0 : index
    %1 = vector.load %arg3[%c0_1, %c0_2] : memref<128x32xbf16, #tpu.memory_space<vmem>>, vector<128x32xbf16>
    %cst = arith.constant dense<0.000000e+00> : vector<8x128xf32>
    %2 = tpu.matmul %0, %1, %cst {dimension_numbers = #tpu.dot_dimension_numbers<[1], [1], [0], [0], [0, 0, 1, 0], [], []>} : vector<8x32xbf16>, vector<128x32xbf16>, vector<8x128xf32> -> vector<8x128xf32>
    %c0_3 = arith.constant 0 : index
    %c0_4 = arith.constant 0 : index
    %3 = vector.load %arg2[%c0_3, %c0_4] : memref<8x1xf32, #tpu.memory_space<vmem>>, vector<8x1xf32>
    %4 = vector.broadcast %3 : vector<8x1xf32> to vector<8x128xf32>
    %5 = arith.subf %2, %4 : vector<8x128xf32>
    %cst_5 = arith.constant dense<0xFF800000> : vector<128xf32>
    %6 = vector.multi_reduction <maximumf>, %5, %cst_5 [0] : vector<8x128xf32> to vector<128xf32>
    %7 = vector.shape_cast %6 : vector<128xf32> to vector<1x128xf32>
    %8 = vector.broadcast %7 : vector<1x128xf32> to vector<8x128xf32>
    %9 = arith.subf %5, %8 : vector<8x128xf32>
    %10 = math.exp %9 : vector<8x128xf32>
    %cst_6 = arith.constant dense<0.000000e+00> : vector<128xf32>
    %11 = vector.multi_reduction <add>, %10, %cst_6 [0] : vector<8x128xf32> to vector<128xf32>
    %12 = vector.shape_cast %11 : vector<128xf32> to vector<1x128xf32>
    %13 = math.log %12 : vector<1x128xf32>
    %14 = arith.addf %7, %13 : vector<1x128xf32>
    %c0_7 = arith.constant 0 : index
    %c0_8 = arith.constant 0 : index
    %15 = vector.load %arg4[%c0_7, %c0_8] : memref<1x128xf32, #tpu.memory_space<vmem>>, vector<1x128xf32>
    tpu.vector_store %arg4[%c0_7, %c0_8], %14 {strides = array<i32>} : memref<1x128xf32, #tpu.memory_space<vmem>>, vector<1x128xf32>,
    return
  }
  func.func @transform_0(%arg0: i32) -> (i32, i32) {
    %c0_i32 = arith.constant 0 : i32
    %c0_i32_0 = arith.constant 0 : i32
    %c0_i32_1 = arith.constant 0 : i32
    return %c0_i32, %c0_i32_0 : i32, i32
  }
  func.func @transform_1(%arg0: i32) -> (i32, i32) {
    %c0_i32 = arith.constant 0 : i32
    %c0_i32_0 = arith.constant 0 : i32
    %c0_i32_1 = arith.constant 0 : i32
    return %c0_i32, %c0_i32_0 : i32, i32
  }
  func.func @transform_2(%arg0: i32) -> (i32, i32) {
    %c0_i32 = arith.constant 0 : i32
    %c0_i32_0 = arith.constant 0 : i32
    return %arg0, %c0_i32 : i32, i32
  }
  func.func @transform_3(%arg0: i32) -> (i32, i32) {
    %c0_i32 = arith.constant 0 : i32
    %c0_i32_0 = arith.constant 0 : i32
    return %c0_i32, %arg0 : i32, i32
  }
}

module attributes {stable_mosaic.version = 11 : i64} {
  func.func @_prepass_kernel(%arg0: i32, %arg1: memref<8x32xf32, #tpu.memory_space<vmem>>, %arg2: memref<8x32xf32, #tpu.memory_space<vmem>>, %arg3: memref<8x32xbf16, #tpu.memory_space<vmem>>, %arg4: memref<8x1xf32, #tpu.memory_space<vmem>>) attributes {dimension_semantics = [#tpu.dimension_semantics<parallel>], iteration_bounds = array<i64: 1>, scalar_prefetch = 0 : i64, scratch_operands = 0 : i64, tpu.core_type = #tpu.core_type<tc>, window_params = [{transform_indices = @transform_0, window_bounds = array<i64: 8, 32>}, {transform_indices = @transform_1, window_bounds = array<i64: 8, 32>}, {transform_indices = @transform_2, window_bounds = array<i64: 8, 32>}, {transform_indices = @transform_3, window_bounds = array<i64: 8, 1>}]} {
    %c0 = arith.constant 0 : index
    %c0_0 = arith.constant 0 : index
    %0 = vector.load %arg1[%c0, %c0_0] : memref<8x32xf32, #tpu.memory_space<vmem>>, vector<8x32xf32>
    %1 = math.tanh %0 : vector<8x32xf32>
    %c0_1 = arith.constant 0 : index
    %c0_2 = arith.constant 0 : index
    %2 = vector.load %arg2[%c0_1, %c0_2] : memref<8x32xf32, #tpu.memory_space<vmem>>, vector<8x32xf32>
    tpu.vector_store %arg2[%c0_1, %c0_2], %1 {strides = array<i32>} : memref<8x32xf32, #tpu.memory_space<vmem>>, vector<8x32xf32>,
    %cst = arith.constant 4.000000e+00 : f32
    %3 = vector.broadcast %cst : f32 to vector<8x32xf32>
    %4 = arith.mulf %1, %3 : vector<8x32xf32>
    %5 = arith.truncf %4 : vector<8x32xf32> to vector<8x32xbf16>
    %c0_3 = arith.constant 0 : index
    %c0_4 = arith.constant 0 : index
    %6 = vector.load %arg3[%c0_3, %c0_4] : memref<8x32xbf16, #tpu.memory_space<vmem>>, vector<8x32xbf16>
    tpu.vector_store %arg3[%c0_3, %c0_4], %5 {strides = array<i32>} : memref<8x32xbf16, #tpu.memory_space<vmem>>, vector<8x32xbf16>,
    %7 = arith.mulf %1, %1 : vector<8x32xf32>
    %cst_5 = arith.constant dense<0.000000e+00> : vector<8xf32>
    %8 = vector.multi_reduction <add>, %7, %cst_5 [1] : vector<8x32xf32> to vector<8xf32>
    %9 = vector.shape_cast %8 : vector<8xf32> to vector<8x1xf32>
    %cst_6 = arith.constant 2.000000e+00 : f32
    %10 = vector.broadcast %cst_6 : f32 to vector<8x1xf32>
    %11 = arith.mulf %10, %9 : vector<8x1xf32>
    %c0_7 = arith.constant 0 : index
    %c0_8 = arith.constant 0 : index
    %12 = vector.load %arg4[%c0_7, %c0_8] : memref<8x1xf32, #tpu.memory_space<vmem>>, vector<8x1xf32>
    tpu.vector_store %arg4[%c0_7, %c0_8], %11 {strides = array<i32>} : memref<8x1xf32, #tpu.memory_space<vmem>>, vector<8x1xf32>,
    return
  }
  func.func @transform_0(%arg0: i32) -> (i32, i32) {
    %c0_i32 = arith.constant 0 : i32
    %c0_i32_0 = arith.constant 0 : i32
    return %arg0, %c0_i32 : i32, i32
  }
  func.func @transform_1(%arg0: i32) -> (i32, i32) {
    %c0_i32 = arith.constant 0 : i32
    %c0_i32_0 = arith.constant 0 : i32
    return %arg0, %c0_i32 : i32, i32
  }
  func.func @transform_2(%arg0: i32) -> (i32, i32) {
    %c0_i32 = arith.constant 0 : i32
    %c0_i32_0 = arith.constant 0 : i32
    return %arg0, %c0_i32 : i32, i32
  }
  func.func @transform_3(%arg0: i32) -> (i32, i32) {
    %c0_i32 = arith.constant 0 : i32
    %c0_i32_0 = arith.constant 0 : i32
    return %arg0, %c0_i32 : i32, i32
  }
}

</mosaic_0001>

<bundles_post_ra>
// kernel: _latent_layer_pallas.2
= control target key start
LH: loop header
LB: loop body
LE: loop exit
PB: predicated region body
PF: predicated region fallthrough
CT: control target
= control target key end

     0   :  { %s107_s0 = inlined_call_operand.vmem [shape: f32[8,32], index: 0, kind: input, shape index: {}]   ;;  %s108_s1 = inlined_call_operand.hbm [shape: f32[8,32], index: 1, kind: output, shape index: {0}]   ;;  %s109_s2 = inlined_call_operand.vmem [shape: bf16[8,32], index: 2, kind: output, shape index: {1}]   ;;  %s110_s3 = inlined_call_operand.vmem [shape: f32[8,1], index: 3, kind: output, shape index: {2}]  }
   0x1   :  { %v12_v0 = vld [vmem:[%s107_s0] sm:$0xff] }
   0x2   :  { %9 = vsyncpa [#allocation3], 0  ;;  %50 = vtanh.f32 %v12_v0  ;;  %vm14_vm0 = vcmask 261120   ;;  %vm18_vm1 = vcmask 257024   ;;  %s74_s16 = smov [#allocation2]  }
   0x3   :  { %s33_s17 = sshll.u32 %s74_s16, 4  ;;  %s34_s17 = int_to_ptr.vmem [resolvable:$true] %s33_s17 }
   0x4   :  { %s52_s18 = scalar_lea.vmem %s34_s17, 128  ;;  %p57_p1 = scmp.lt.s32.totalorder %s34_s17, %s34_s17 }
   0x5   :  { %p53_p0 = scmp.ne.s32.totalorder %s34_s17, %s52_s18  ;;  %p58_p2 = scmp.lt.s32.totalorder %s52_s18, %s52_s18 }
   0x7   :  { %p59_p3 = por %p58_p2, %p57_p1 }
   0x9   :  { %p60_p4 = pnand %p59_p3, %p53_p0 }
   0xf   :  { %v51_v1 = vpop.eup %50 }
  0x10   :  { %v16_v2 = vmul.f32 4.0, %v51_v1  ;;  %v20_v3 = vmul.f32 %v51_v1, %v51_v1  ;;  %15 = vst.msk [vmem:[#allocation2] sm:$0xff] %vm14_vm0, %v51_v1 }
  0x12   :  { %v17_v4 = vpack.c.bf16 %v16_v2, %v16_v2  ;;  %v21_v5 = vsel %vm14_vm0, %v20_v3, 0.0 }
  0x13   :  { %22 = vadd.xlane.f32.xlu0 %v21_v5 }
  0x14   :  { %19 = vst.msk [vmem:[%s109_s2] sm:$0xf] %vm18_vm1, %v17_v4 }
  0x15   :  { %63 = shalt.err (!%p60_p4)
}
  0x16   :  { %36 = dma.vmem_to_hbm [thread:$0]  %s34_s17, 128, %s108_s1, [#allocation3]   ;;  %vm25_vm2 = vcmask 7168  }
  0x9c   :  { %v23_v6 = vpop.xlane.xlu0 %22 }
  0x9d   :  { %v24_v7 = vmul.f32 2.0, %v23_v6 }
  0x9f   :  { %26 = vst.msk [vmem:[%s110_s3] sm:$0xff] %vm25_vm2, %v24_v7 }
  0xa0   :  { %72 = dma.done.wait [#allocation3], 128  }
  0xa1   :  { %73 = vsyncadd [#allocation3], 4294967168 }
  0xa2   :  { %48 = vsyncpa [#allocation3], 1 }

// kernel: _latent_layer_pallas.3
= control target key start
LH: loop header
LB: loop body
LE: loop exit
PB: predicated region body
PF: predicated region fallthrough
CT: control target
= control target key end

     0   :  { %vm72_vm0 = vcmask 261120   ;;  %v224_v0 = vmov 0.0   ;;  %vm225_vm1 = vmmov 0   ;;  %v226_v2 = vmov 0   ;;  %s289_s2 = inlined_call_operand.vmem [shape: bf16[128,32], index: 2, kind: input, shape index: {}]   ;;  %s290_s1 = inlined_call_operand.vmem [shape: f32[8,1], index: 1, kind: input, shape index: {}]   ;;  %s291_s0 = inlined_call_operand.vmem [shape: bf16[8,32], index: 0, kind: input, shape index: {}]   ;;  %s292_s3 = inlined_call_operand.vmem [shape: f32[1,128], index: 3, kind: output, shape index: {}]  }
   0x1   :  { %188 = vmatprep.subr.bf16.mxu0 %v224_v0  ;;  %v212_v1 = vld [vmem:[%s289_s2 + $0x38] sm:$0xff]   ;;  %204 = vmatprep.mubr.msk.bf16.mxu0 %vm225_vm1, %v224_v0  ;;  %v213_v4 = vld [vmem:[%s289_s2 + $0x30] sm:$0xff]   ;;  %v140_v6 = vld [vmem:[%s290_s1] sm:$0xff] }
   0x2   :  { %211 = vset.pattern.permute.xlu0 %v226_v2  ;;  %v98_v3 = vsel %vm72_vm0, %v212_v1, 0  ;;  %v95_v5 = vsel %vm72_vm0, %v213_v4, 0  ;;  %v214_v7 = vld [vmem:[%s289_s2 + $0x28] sm:$0xff]   ;;  %v215_v9 = vld [vmem:[%s289_s2 + $0x20] sm:$0xff]   ;;  %v216_v11 = vld [vmem:[%s289_s2 + $0x18] sm:$0xff]  }
   0x3   :  { %189 = vmatpush3.bf16.xpose.msra.mxu0 %v98_v3  ;;  %143 = vperm.xlu0 %211, %v140_v6   ;;  %v92_v8 = vsel %vm72_vm0, %v214_v7, 0  ;;  %v89_v10 = vsel %vm72_vm0, %v215_v9, 0  ;;  %v86_v12 = vsel %vm72_vm0, %v216_v11, 0  ;;  %v217_v13 = vld [vmem:[%s289_s2 + $0x10] sm:$0xff]   ;;  %v218_v15 = vld [vmem:[%s289_s2 + $0x8] sm:$0xff]   ;;  %v219_v17 = vld [vmem:[%s289_s2] sm:$0xff]  }
   0x4   :  { %190 = vmatprep.subr.bf16.mxu0 %v224_v0  ;;  %v83_v14 = vsel %vm72_vm0, %v217_v13, 0  ;;  %v80_v16 = vsel %vm72_vm0, %v218_v15, 0  ;;  %v77_v18 = vsel %vm72_vm0, %v219_v17, 0  ;;  %v15_v19 = vld [vmem:[%s291_s0] sm:$0xf] }
   0xb   :  { %191 = vmatpush3.bf16.xpose.msra.mxu0 %v95_v5 }
   0xc   :  { %192 = vmatprep.subr.bf16.mxu0 %v224_v0 }
  0x13   :  { %193 = vmatpush3.bf16.xpose.msra.mxu0 %v92_v8 }
  0x14   :  { %194 = vmatprep.subr.bf16.mxu0 %v224_v0 }
  0x1b   :  { %195 = vmatpush3.bf16.xpose.msra.mxu0 %v89_v10 }
  0x1c   :  { %196 = vmatprep.subr.bf16.mxu0 %v224_v0 }
  0x23   :  { %197 = vmatpush3.bf16.xpose.msra.mxu0 %v86_v12 }
  0x24   :  { %198 = vmatprep.subr.bf16.mxu0 %v224_v0 }
  0x2b   :  { %199 = vmatpush3.bf16.xpose.msra.mxu0 %v83_v14 }
  0x2c   :  { %200 = vmatprep.subr.bf16.mxu0 %v224_v0 }
  0x33   :  { %201 = vmatpush3.bf16.xpose.msra.mxu0 %v80_v16 }
  0x34   :  { %202 = vmatprep.subr.bf16.mxu0 %v224_v0 }
  0x3b   :  { %203 = vmatpush3.bf16.xpose.msra.mxu0 %v77_v18 }
  0x42   :  { %205 = vmatmul.mubr.msk.bf16.vlgmr.msra.gmra.mxu0 %vm72_vm0, %v15_v19 }
  0x7e   :  { %v144_v20 = vpop.permute.xlu0 %143 }
 0x102   :  { %v134_v21 = vpop.f32.mrf.mxu0 }
 0x103   :  { %v146_v22 = vsub.f32 %v134_v21, %v144_v20 }
 0x104   :  { %v206_v23 = vpop.f32.mrf.mxu0 }
 0x105   :  { %v147_v24 = vrot.slane %v146_v22, 4 }
 0x106   :  { %v137_v25 = vpop.f32.mrf.mxu0 }
 0x107   :  { %v148_v26 = vmax.f32 %v146_v22, %v147_v24 }
 0x108   :  { %v207_v27 = vpop.f32.mrf.mxu0 }
 0x109   :  { %v149_v28 = vrot.slane %v148_v26, 2 }
 0x10b   :  { %v150_v29 = vmax.f32 %v148_v26, %v149_v28 }
 0x10d   :  { %v151_v30 = vrot.slane %v150_v29, 1 }
 0x10f   :  { %v152_v31 = vmax.f32 %v150_v29, %v151_v30 }
 0x111   :  { %v153_v32 = vsub.f32 %v146_v22, %v152_v31 }
 0x113   :  { %v154_v33 = vmul.f32 1.442695, %v153_v32 }
 0x115   :  { %220 = vpow2.f32 %v154_v33 }
 0x122   :  { %v221_v34 = vpop.eup %220 }
 0x123   :  { %v156_v35 = vrot.slane %v221_v34, 4 }
 0x125   :  { %v157_v36 = vadd.f32 %v221_v34, %v156_v35 }
 0x127   :  { %v158_v37 = vrot.slane %v157_v36, 2 }
 0x129   :  { %v159_v38 = vadd.f32 %v158_v37, %v157_v36 }
 0x12b   :  { %v160_v39 = vrot.slane %v159_v38, 1 }
 0x12d   :  { %v161_v40 = vadd.f32 %v160_v39, %v159_v38 }
 0x12f   :  { %222 = vlog2.f32 %v161_v40 }
 0x13c   :  { %v223_v41 = vpop.eup %222 }
 0x13d   :  { %v163_v42 = vmul.f32 0.6931472, %v223_v41 }
 0x13f   :  { %v164_v43 = vadd.f32 %v163_v42, %v152_v31 }
 0x141   :  { %165 = vst [vmem:[%s292_s3] sm:$0x1] %v164_v43 }

</bundles_post_ra>
